<compile_context>
chip_gen: v7x
topology: tpu7x:2x2x1
jax: 0.10.0
libtpu: 0.0.40
codegen_flags: <defaults>
</compile_context>

<pallas_src>
from functools import partial

import numpy as np
import jax
import jax.numpy as jnp
from jax import lax
from jax.experimental import pallas as pl
from jax.experimental.pallas import tpu as pltpu

_EPS = 1e-5
_INV_SQRT2 = 1.0 / np.sqrt(2.0)
_LANE = 128


def _round_up(x, m):
    return (x + m - 1) // m * m


def _cdiv(a, b):
    return -(-a // b)


def _gelu(h, approximate):
    # Exact erf GELU matches torch.nn.functional.gelu default. The tanh form
    # moves the transcendental to the EUP slot (useful if VALU-bound on v5e).
    if approximate:
        c = np.float32(np.sqrt(2.0 / np.pi))
        return 0.5 * h * (1.0 + jnp.tanh(c * (h + np.float32(0.044715) * h * h * h)))
    return 0.5 * h * (1.0 + lax.erf(h * np.float32(_INV_SQRT2)))


# ---------------------------------------------------------------------------
# Path A: single spatial tile -> one pass, x read once, centered variance.
# ---------------------------------------------------------------------------
def _proj_single_kernel(x_ref, w1_ref, g_ref, beta_ref, w2_ref, b2_ref, o_ref,
                        *, inv_hw, hw_valid, padded, approximate_gelu):
    xt = x_ref[...].astype(w1_ref.dtype)
    h = jnp.dot(w1_ref[...], xt, preferred_element_type=jnp.float32)   # (Hid, HWp)
    mean = jnp.sum(h, axis=1, keepdims=True) * inv_hw                  # pads give h==0
    hc = h - mean
    if padded:
        # Padded lanes carry hc == -mean; mask them out of the variance only.
        lane = lax.broadcasted_iota(jnp.int32, h.shape, 1)
        hc_stats = jnp.where(lane < hw_valid, hc, 0.0)
    else:
        hc_stats = hc
    var = jnp.sum(hc_stats * hc_stats, axis=1, keepdims=True) * inv_hw
    scale = g_ref[...] * lax.rsqrt(var + _EPS)
    hn = hc * scale + beta_ref[...]
    ha = _gelu(hn, approximate_gelu)
    y = jnp.dot(w2_ref[...], ha.astype(w2_ref.dtype),
                preferred_element_type=jnp.float32) + b2_ref[...]
    o_ref[...] = y.astype(o_ref.dtype)


# ---------------------------------------------------------------------------
# Path B: two-pass with the fc1 activation resident in VMEM (x read once).
# ---------------------------------------------------------------------------
def _proj_resident_kernel(x_ref, w1_ref, g_ref, beta_ref, w2_ref, b2_ref, o_ref,
                          h_slab, sum_ref, sq_ref, scale_ref, shift_ref,
                          *, inv_hw, tile_hw, approximate_gelu):
    p = pl.program_id(1)   # 0 = stats/store-h pass, 1 = apply pass
    t = pl.program_id(2)   # spatial tile

    @pl.when(p == 0)
    def _():
        @pl.when(t == 0)
        def _():
            sum_ref[...] = jnp.zeros_like(sum_ref)
            sq_ref[...] = jnp.zeros_like(sq_ref)
        xt = x_ref[...].astype(w1_ref.dtype)
        h = jnp.dot(w1_ref[...], xt, preferred_element_type=jnp.float32)
        start = pl.multiple_of(t * tile_hw, tile_hw)
        h_slab[:, pl.ds(start, tile_hw)] = h.astype(h_slab.dtype)
        # NOTE: E[h^2]-mean^2 in f32; acceptable here since h is zero-mean-ish
        # after the fc1-bias drop (see correctness note in the wrapper).
        sum_ref[...] += jnp.sum(h, axis=1, keepdims=True)
        sq_ref[...] += jnp.sum(h * h, axis=1, keepdims=True)

    @pl.when(p == 1)
    def _():
        @pl.when(t == 0)
        def _():
            mean = sum_ref[...] * inv_hw
            var = jnp.maximum(sq_ref[...] * inv_hw - mean * mean, 0.0)
            scale = g_ref[...] * lax.rsqrt(var + _EPS)
            scale_ref[...] = scale
            shift_ref[...] = beta_ref[...] - mean * scale
        start = pl.multiple_of(t * tile_hw, tile_hw)
        h = h_slab[:, pl.ds(start, tile_hw)].astype(jnp.float32)
        hn = h * scale_ref[...] + shift_ref[...]
        ha = _gelu(hn, approximate_gelu)
        y = jnp.dot(w2_ref[...], ha.astype(w2_ref.dtype),
                    preferred_element_type=jnp.float32) + b2_ref[...]
        o_ref[...] = y.astype(o_ref.dtype)


# ---------------------------------------------------------------------------
# Path C: two-pass fallback for huge HW — Gram-matrix stats (phase 0 is pure
# x-DMA bound: only Cin^2 MXU work per tile), fc1 computed once in phase 1.
# ---------------------------------------------------------------------------
def _proj_gram_kernel(x_ref, w1_ref, g_ref, beta_ref, w2_ref, b2_ref, o_ref,
                      gram_ref, sx_ref, scale_ref, shift_ref,
                      *, inv_hw, approximate_gelu):
    p = pl.program_id(1)
    t = pl.program_id(2)

    @pl.when(p == 0)
    def _():
        @pl.when(t == 0)
        def _():
            gram_ref[...] = jnp.zeros_like(gram_ref)
            sx_ref[...] = jnp.zeros_like(sx_ref)
        xt = x_ref[...].astype(w1_ref.dtype)
        gram_ref[...] += jnp.einsum('cp,dp->cd', xt, xt,
                                    preferred_element_type=jnp.float32)
        sx_ref[...] += jnp.sum(x_ref[...].astype(jnp.float32), axis=1,
                               keepdims=True)

    @pl.when(p == 1)
    def _():
        @pl.when(t == 0)
        def _():
            w1f = w1_ref[...].astype(jnp.float32)
            s = jnp.dot(w1f, sx_ref[...], preferred_element_type=jnp.float32)
            wg = jnp.dot(w1f, gram_ref[...], preferred_element_type=jnp.float32)
            sq = jnp.sum(wg * w1f, axis=1, keepdims=True)
            mean = s * inv_hw
            var = jnp.maximum(sq * inv_hw - mean * mean, 0.0)
            scale = g_ref[...] * lax.rsqrt(var + _EPS)
            scale_ref[...] = scale
            shift_ref[...] = beta_ref[...] - mean * scale
        xt = x_ref[...].astype(w1_ref.dtype)
        h = jnp.dot(w1_ref[...], xt, preferred_element_type=jnp.float32)
        hn = h * scale_ref[...] + shift_ref[...]
        ha = _gelu(hn, approximate_gelu)
        y = jnp.dot(w2_ref[...], ha.astype(w2_ref.dtype),
                    preferred_element_type=jnp.float32) + b2_ref[...]
        o_ref[...] = y.astype(o_ref.dtype)


def projection_pallas(x, params, *, in_channels, permutation_invariant=False,
                      tile_hw=None, matmul_dtype=None,
                      h_slab_budget_bytes=None, approximate_gelu=False):
    """x: (B, C, H, W) NCHW, like the PyTorch module."""
    w1, b1, gamma, beta, w2, b2 = params
    del b1  # mathematically cancelled by the InstanceNorm mean subtraction
    batch = x.shape[0]
    out_dtype = x.dtype

    if permutation_invariant:
        assert x.shape[1] % in_channels == 0, (
            "Total Number of Channels is not divisible by number of tokens")
        g = x.shape[1] // in_channels
        # 'b (g c) h w -> (b g) c h w'
        x = x.reshape(batch * g, in_channels, x.shape[2], x.shape[3])

    B, Cin, H, W = x.shape
    HW = H * W
    Hid = w1.shape[0]
    Cout = w2.shape[0]

    # Matmul operand dtype: follow the input (feed bf16 on v6e/v7x for full MXU
    # rate; accumulation is always f32).  Norm/GELU math stays f32.
    if matmul_dtype is None:
        matmul_dtype = x.dtype
    matmul_dtype = jnp.dtype(matmul_dtype)

    x_item = jnp.dtype(x.dtype).itemsize
    out_item = jnp.dtype(out_dtype).itemsize
    comp_item = matmul_dtype.itemsize

    # ---- generation-aware VMEM budgets (clamped to the actual chip) --------
    try:
        vmem_cap = int(pltpu.get_tpu_info().vmem_capacity_bytes)
    except Exception:
        vmem_cap = 64 * 1024 * 1024  # conservative (v7x per-TC)
    block_budget = min(32 << 20, vmem_cap // 4)            # per-step streamed blocks
    tile_cap = 8192 if vmem_cap >= (100 << 20) else 4096   # lane-multiple tile cap
    if h_slab_budget_bytes is None:
        h_slab_budget_bytes = min(48 << 20, (3 * vmem_cap) // 8)  # ~24 MiB on v7x

    # ---- spatial tiling with minimal padding --------------------------------
    hw128 = _round_up(HW, _LANE)
    if tile_hw is None:
        per_col = (2 * Cin * x_item + 2 * Cout * out_item
                   + Hid * (3 * 4 + comp_item))
        tile_hw = max(_LANE, min(tile_cap, (block_budget // per_col) // _LANE * _LANE))
    else:
        tile_hw = max(_LANE, _round_up(int(tile_hw), _LANE))

    if tile_hw >= hw128:
        tile_hw, n_tiles, hw_pad = hw128, 1, hw128
    else:
        n_tiles = _cdiv(hw128, tile_hw)
        # Rebalance so the padding is < 128 * n_tiles columns total.
        tile_hw = _round_up(_cdiv(hw128, n_tiles), _LANE)
        hw_pad = tile_hw * n_tiles

    x_flat = x.reshape(B, Cin, HW)          # free view; NO dtype cast here
    if hw_pad != HW:
        # Zero padding: with the fc1 bias dropped, padded columns give h == 0,
        # so stats need no lane mask (we divide by the true HW).
        x_flat = jnp.pad(x_flat, ((0, 0), (0, 0), (0, hw_pad - HW)))

    w1c = w1.astype(matmul_dtype)
    w2c = w2.astype(matmul_dtype)
    gamma32 = gamma.astype(jnp.float32)
    beta32 = beta.astype(jnp.float32)
    b2_32 = b2.astype(jnp.float32)
    inv_hw = np.float32(1.0 / HW)

    slab_bytes = Hid * hw_pad * comp_item
    use_single = (n_tiles == 1)
    use_resident = (not use_single) and (slab_bytes <= h_slab_budget_bytes)

    # ---- VMEM limit: rough usage + headroom, hard-clamped to 80% of chip ----
    const_bytes = (Hid * Cin + Cout * Hid) * comp_item + (2 * Hid + Cout + 1) * 4
    usage = (2 * Cin * tile_hw * x_item            # double-buffered x block
             + 2 * Cout * tile_hw * out_item       # double-buffered out block
             + 2 * const_bytes                     # double-buffered params
             + 4 * Hid * tile_hw * 4               # f32 intermediates (h, hn, ha, ...)
             + (slab_bytes if use_resident else 0)
             + 8 * Hid * 4 + 2 * Cin * Cin * 4)    # small scratches
    vmem_limit = int(min(int(vmem_cap * 0.8), max(32 << 20, usage + (8 << 20))))
    vmem_limit = int(min(vmem_limit, int(vmem_cap * 0.8)))

    const_map3 = lambda b, p, t: (0, 0)

    if use_single:
        kernel = partial(_proj_single_kernel, inv_hw=inv_hw, hw_valid=HW,
                         padded=(hw_pad != HW), approximate_gelu=approximate_gelu)
        grid = (B,)
        in_specs = [
            pl.BlockSpec((None, Cin, hw_pad), lambda b: (b, 0, 0)),   # x
            pl.BlockSpec((Hid, Cin), lambda b: (0, 0)),               # w1
            pl.BlockSpec((Hid, 1), lambda b: (0, 0)),                 # gamma
            pl.BlockSpec((Hid, 1), lambda b: (0, 0)),                 # beta
            pl.BlockSpec((Cout, Hid), lambda b: (0, 0)),              # w2
            pl.BlockSpec((Cout, 1), lambda b: (0, 0)),                # b2
        ]
        out_specs = pl.BlockSpec((None, Cout, hw_pad), lambda b: (b, 0, 0))
        scratch = []
        dims = ("parallel",)
    else:
        grid = (B, 2, n_tiles)   # batch x {stats, apply} x spatial tile
        if use_resident:
            kernel = partial(_proj_resident_kernel, inv_hw=inv_hw,
                             tile_hw=tile_hw, approximate_gelu=approximate_gelu)
            # Phase 1 reads h from the VMEM slab, so park the x block at tile 0
            # (no x DMAs during phase 1 beyond one tile at the phase switch).
            x_map = lambda b, p, t: (b, 0, t * (1 - p))
            scratch = [pltpu.VMEM((Hid, hw_pad), matmul_dtype),       # resident h
                       pltpu.VMEM((Hid, 1), jnp.float32),             # sum
                       pltpu.VMEM((Hid, 1), jnp.float32),             # sumsq
                       pltpu.VMEM((Hid, 1), jnp.float32),             # scale
                       pltpu.VMEM((Hid, 1), jnp.float32)]             # shift
        else:
            kernel = partial(_proj_gram_kernel, inv_hw=inv_hw,
                             approximate_gelu=approximate_gelu)
            x_map = lambda b, p, t: (b, 0, t)                          # stream both phases
            scratch = [pltpu.VMEM((Cin, Cin), jnp.float32),            # Gram
                       pltpu.VMEM((Cin, 1), jnp.float32),              # sum(x)
                       pltpu.VMEM((Hid, 1), jnp.float32),              # scale
                       pltpu.VMEM((Hid, 1), jnp.float32)]              # shift
        in_specs = [
            pl.BlockSpec((None, Cin, tile_hw), x_map),
            pl.BlockSpec((Hid, Cin), const_map3),
            pl.BlockSpec((Hid, 1), const_map3),
            pl.BlockSpec((Hid, 1), const_map3),
            pl.BlockSpec((Cout, Hid), const_map3),
            pl.BlockSpec((Cout, 1), const_map3),
        ]
        # Phase 0 parks the (never-written) output block at tile 0; phase 1
        # fully overwrites every block before its index changes, so no stale
        # data reaches HBM and no output block is revisited after being left.
        out_specs = pl.BlockSpec((None, Cout, tile_hw),
                                 lambda b, p, t: (b, 0, t * p))
        dims = ("parallel", "arbitrary", "arbitrary")

    out = pl.pallas_call(
        kernel,
        out_shape=jax.ShapeDtypeStruct((B, Cout, hw_pad), out_dtype),
        grid_spec=pltpu.PrefetchScalarGridSpec(
            num_scalar_prefetch=0,
            grid=grid,
            in_specs=in_specs,
            out_specs=out_specs,
            scratch_shapes=scratch),
        compiler_params=pltpu.CompilerParams(
            dimension_semantics=dims,
            vmem_limit_bytes=vmem_limit),
    )(x_flat, w1c, gamma32, beta32, w2c, b2_32)

    out = out[:, :, :HW].reshape(B, Cout, H, W)
    if permutation_invariant:
        # '(b g) c h w -> b (g c) h w'
        out = out.reshape(batch, -1, H, W)
    return out


def projection_ref(x, params, *, in_channels, permutation_invariant=False):
    """Pure-JAX reference mirroring the PyTorch forward (keeps the fc1 bias)."""
    w1, b1, gamma, beta, w2, b2 = params
    batch = x.shape[0]
    if permutation_invariant:
        x = x.reshape(batch * (x.shape[1] // in_channels), in_channels,
                      x.shape[2], x.shape[3])
    B, Cin, H, W = x.shape
    xf = x.reshape(B, Cin, H * W).astype(jnp.float32)
    h = jnp.einsum('oc,bcp->bop', w1.astype(jnp.float32), xf) + b1[None]
    mean = jnp.mean(h, axis=2, keepdims=True)
    var = jnp.mean((h - mean) ** 2, axis=2, keepdims=True)
    hn = (h - mean) * lax.rsqrt(var + _EPS) * gamma[None] + beta[None]
    ha = 0.5 * hn * (1.0 + lax.erf(hn * _INV_SQRT2))
    y = jnp.einsum('oc,bcp->bop', w2.astype(jnp.float32), ha) + b2[None]
    y = y.reshape(B, -1, H, W).astype(x.dtype)
    if permutation_invariant:
        y = y.reshape(batch, -1, H, W)
    return y


def make_params(key, in_channels, hidden_channels, out_channels):
    """Deterministic synthetic parameters (shapes match the nn.Module)."""
    k1, k2, k3, k4, k5, k6 = jax.random.split(key, 6)
    w1 = jax.random.normal(k1, (hidden_channels, in_channels), jnp.float32) * 0.3
    b1 = jax.random.normal(k2, (hidden_channels, 1), jnp.float32) * 0.1
    gamma = 1.0 + 0.1 * jax.random.normal(k3, (hidden_channels, 1), jnp.float32)
    beta = 0.1 * jax.random.normal(k4, (hidden_channels, 1), jnp.float32)
    w2 = jax.random.normal(k5, (out_channels, hidden_channels), jnp.float32) * 0.3
    b2 = jax.random.normal(k6, (out_channels, 1), jnp.float32) * 0.1
    return (w1, b1, gamma, beta, w2, b2)


if __name__ == "__main__":
    key = jax.random.PRNGKey(0)
    kx, kp, kx2, kx3 = jax.random.split(key, 4)

    B, Cin, Hid, Cout, H, W = 2, 4, 8, 4, 16, 16
    x = jax.random.normal(kx, (B, Cin, H, W), jnp.float32)
    params = make_params(kp, Cin, Hid, Cout)
    ref = projection_ref(x, params, in_channels=Cin)

    # 1) default path -> single-pass kernel (whole spatial slab in one tile)
    out = jax.block_until_ready(projection_pallas(x, params, in_channels=Cin))
    np.testing.assert_allclose(np.asarray(out), np.asarray(ref),
                               rtol=1e-4, atol=1e-4)

    # 2) forced multi-tile -> resident-h two-pass kernel
    out_b = jax.block_until_ready(
        projection_pallas(x, params, in_channels=Cin, tile_hw=128))
    np.testing.assert_allclose(np.asarray(out_b), np.asarray(ref),
                               rtol=1e-4, atol=1e-4)

    # 3) forced multi-tile with zero slab budget -> Gram-stats fallback kernel
    out_c = jax.block_until_ready(
        projection_pallas(x, params, in_channels=Cin, tile_hw=128,
                          h_slab_budget_bytes=0))
    np.testing.assert_allclose(np.asarray(out_c), np.asarray(ref),
                               rtol=1e-4, atol=1e-4)

    # 4) non-128-multiple spatial size, single-pass (masked centered variance)
    x3 = jax.random.normal(kx2, (B, Cin, 10, 10), jnp.float32)
    out3 = jax.block_until_ready(projection_pallas(x3, params, in_channels=Cin))
    ref3 = projection_ref(x3, params, in_channels=Cin)
    np.testing.assert_allclose(np.asarray(out3), np.asarray(ref3),
                               rtol=1e-4, atol=1e-4)

    # 5) non-128-multiple spatial size, multi-tile resident-h path (zero pads)
    x5 = jax.random.normal(kx3, (B, Cin, 20, 20), jnp.float32)
    out5 = jax.block_until_ready(
        projection_pallas(x5, params, in_channels=Cin, tile_hw=128))
    ref5 = projection_ref(x5, params, in_channels=Cin)
    np.testing.assert_allclose(np.asarray(out5), np.asarray(ref5),
                               rtol=1e-4, atol=1e-4)

    # 6) permutation_invariant regrouping (pure view change around the kernel)
    x4 = jax.random.normal(kx, (B, 2 * Cin, H, W), jnp.float32)
    out4 = jax.block_until_ready(
        projection_pallas(x4, params, in_channels=Cin, permutation_invariant=True))
    ref4 = projection_ref(x4, params, in_channels=Cin, permutation_invariant=True)
    np.testing.assert_allclose(np.asarray(out4), np.asarray(ref4),
                               rtol=1e-4, atol=1e-4)

    print("KERNEL_OK")
</pallas_src>

<mosaic_0001>
module attributes {stable_mosaic.version = 11 : i64} {
  func.func @_proj_single_kernel(%arg0: i32, %arg1: memref<1x4x256xf32, #tpu.memory_space<vmem>>, %arg2: memref<8x4xf32, #tpu.memory_space<vmem>>, %arg3: memref<8x1xf32, #tpu.memory_space<vmem>>, %arg4: memref<8x1xf32, #tpu.memory_space<vmem>>, %arg5: memref<4x8xf32, #tpu.memory_space<vmem>>, %arg6: memref<4x1xf32, #tpu.memory_space<vmem>>, %arg7: memref<1x4x256xf32, #tpu.memory_space<vmem>>) attributes {dimension_semantics = [#tpu.dimension_semantics<parallel>], iteration_bounds = array<i64: 2>, scalar_prefetch = 0 : i64, scratch_operands = 0 : i64, tpu.core_type = #tpu.core_type<tc>, window_params = [{transform_indices = @transform_0, window_bounds = array<i64: 1, 4, 256>}, {pipeline_mode = #tpu.pipeline_mode<synchronous>, transform_indices = @transform_1, window_bounds = array<i64: 8, 4>}, {pipeline_mode = #tpu.pipeline_mode<synchronous>, transform_indices = @transform_2, window_bounds = array<i64: 8, 1>}, {pipeline_mode = #tpu.pipeline_mode<synchronous>, transform_indices = @transform_3, window_bounds = array<i64: 8, 1>}, {pipeline_mode = #tpu.pipeline_mode<synchronous>, transform_indices = @transform_4, window_bounds = array<i64: 4, 8>}, {pipeline_mode = #tpu.pipeline_mode<synchronous>, transform_indices = @transform_5, window_bounds = array<i64: 4, 1>}, {transform_indices = @transform_6, window_bounds = array<i64: 1, 4, 256>}]} {
    %c0 = arith.constant 0 : index
    %c0_0 = arith.constant 0 : index
    %c0_1 = arith.constant 0 : index
    %0 = vector.load %arg1[%c0, %c0_0, %c0_1] : memref<1x4x256xf32, #tpu.memory_space<vmem>>, vector<1x4x256xf32>
    %1 = vector.shape_cast %0 : vector<1x4x256xf32> to vector<4x256xf32>
    %c0_2 = arith.constant 0 : index
    %c0_3 = arith.constant 0 : index
    %2 = vector.load %arg2[%c0_2, %c0_3] : memref<8x4xf32, #tpu.memory_space<vmem>>, vector<8x4xf32>
    %cst = arith.constant dense<0.000000e+00> : vector<8x256xf32>
    %3 = tpu.matmul %2, %1, %cst {dimension_numbers = #tpu.dot_dimension_numbers<[1], [0], [0], [1], [0, 0, 1, 1], [], []>} : vector<8x4xf32>, vector<4x256xf32>, vector<8x256xf32> -> vector<8x256xf32>
    %cst_4 = arith.constant dense<0.000000e+00> : vector<8xf32>
    %4 = vector.multi_reduction <add>, %3, %cst_4 [1] : vector<8x256xf32> to vector<8xf32>
    %5 = vector.shape_cast %4 : vector<8xf32> to vector<8x1xf32>
    %cst_5 = arith.constant 3.906250e-03 : f32
    %6 = vector.broadcast %cst_5 : f32 to vector<8x1xf32>
    %7 = arith.mulf %5, %6 : vector<8x1xf32>
    %8 = vector.broadcast %7 : vector<8x1xf32> to vector<8x256xf32>
    %9 = arith.subf %3, %8 : vector<8x256xf32>
    %10 = arith.mulf %9, %9 : vector<8x256xf32>
    %cst_6 = arith.constant dense<0.000000e+00> : vector<8xf32>
    %11 = vector.multi_reduction <add>, %10, %cst_6 [1] : vector<8x256xf32> to vector<8xf32>
    %12 = vector.shape_cast %11 : vector<8xf32> to vector<8x1xf32>
    %cst_7 = arith.constant 3.906250e-03 : f32
    %13 = vector.broadcast %cst_7 : f32 to vector<8x1xf32>
    %14 = arith.mulf %12, %13 : vector<8x1xf32>
    %c0_8 = arith.constant 0 : index
    %c0_9 = arith.constant 0 : index
    %15 = vector.load %arg3[%c0_8, %c0_9] : memref<8x1xf32, #tpu.memory_space<vmem>>, vector<8x1xf32>
    %cst_10 = arith.constant 9.99999974E-6 : f32
    %16 = vector.broadcast %cst_10 : f32 to vector<8x1xf32>
    %17 = arith.addf %14, %16 : vector<8x1xf32>
    %18 = math.rsqrt %17 : vector<8x1xf32>
    %19 = arith.mulf %15, %18 : vector<8x1xf32>
    %20 = vector.broadcast %19 : vector<8x1xf32> to vector<8x256xf32>
    %21 = arith.mulf %9, %20 : vector<8x256xf32>
    %c0_11 = arith.constant 0 : index
    %c0_12 = arith.constant 0 : index
    %22 = vector.load %arg4[%c0_11, %c0_12] : memref<8x1xf32, #tpu.memory_space<vmem>>, vector<8x1xf32>
    %23 = vector.broadcast %22 : vector<8x1xf32> to vector<8x256xf32>
    %24 = arith.addf %21, %23 : vector<8x256xf32>
    %cst_13 = arith.constant 5.000000e-01 : f32
    %25 = vector.broadcast %cst_13 : f32 to vector<8x256xf32>
    %26 = arith.mulf %25, %24 : vector<8x256xf32>
    %cst_14 = arith.constant 0.707106769 : f32
    %27 = vector.broadcast %cst_14 : f32 to vector<8x256xf32>
    %28 = arith.mulf %24, %27 : vector<8x256xf32>
    %29 = math.erf %28 : vector<8x256xf32>
    %cst_15 = arith.constant 1.000000e+00 : f32
    %30 = vector.broadcast %cst_15 : f32 to vector<8x256xf32>
    %31 = arith.addf %30, %29 : vector<8x256xf32>
    %32 = arith.mulf %26, %31 : vector<8x256xf32>
    %c0_16 = arith.constant 0 : index
    %c0_17 = arith.constant 0 : index
    %33 = vector.load %arg5[%c0_16, %c0_17] : memref<4x8xf32, #tpu.memory_space<vmem>>, vector<4x8xf32>
    %cst_18 = arith.constant dense<0.000000e+00> : vector<4x256xf32>
    %34 = tpu.matmul %33, %32, %cst_18 {dimension_numbers = #tpu.dot_dimension_numbers<[1], [0], [0], [1], [0, 0, 1, 1], [], []>} : vector<4x8xf32>, vector<8x256xf32>, vector<4x256xf32> -> vector<4x256xf32>
    %c0_19 = arith.constant 0 : index
    %c0_20 = arith.constant 0 : index
    %35 = vector.load %arg6[%c0_19, %c0_20] : memref<4x1xf32, #tpu.memory_space<vmem>>, vector<4x1xf32>
    %36 = vector.broadcast %35 : vector<4x1xf32> to vector<4x256xf32>
    %37 = arith.addf %34, %36 : vector<4x256xf32>
    %c0_21 = arith.constant 0 : index
    %c0_22 = arith.constant 0 : index
    %c0_23 = arith.constant 0 : index
    %38 = vector.load %arg7[%c0_21, %c0_22, %c0_23] : memref<1x4x256xf32, #tpu.memory_space<vmem>>, vector<1x4x256xf32>
    %39 = vector.shape_cast %38 : vector<1x4x256xf32> to vector<4x256xf32>
    %40 = vector.shape_cast %37 : vector<4x256xf32> to vector<1x4x256xf32>
    tpu.vector_store %arg7[%c0_21, %c0_22, %c0_23], %40 {strides = array<i32>} : memref<1x4x256xf32, #tpu.memory_space<vmem>>, vector<1x4x256xf32>,
    return
  }
  func.func @transform_0(%arg0: i32) -> (i32, i32, i32) {
    %c0_i32 = arith.constant 0 : i32
    %c0_i32_0 = arith.constant 0 : i32
    %c0_i32_1 = arith.constant 0 : i32
    return %arg0, %c0_i32, %c0_i32_0 : i32, i32, i32
  }
  func.func @transform_1(%arg0: i32) -> (i32, i32) {
    %c0_i32 = arith.constant 0 : i32
    %c0_i32_0 = arith.constant 0 : i32
    %c0_i32_1 = arith.constant 0 : i32
    return %c0_i32, %c0_i32_0 : i32, i32
  }
  func.func @transform_2(%arg0: i32) -> (i32, i32) {
    %c0_i32 = arith.constant 0 : i32
    %c0_i32_0 = arith.constant 0 : i32
    %c0_i32_1 = arith.constant 0 : i32
    return %c0_i32, %c0_i32_0 : i32, i32
  }
  func.func @transform_3(%arg0: i32) -> (i32, i32) {
    %c0_i32 = arith.constant 0 : i32
    %c0_i32_0 = arith.constant 0 : i32
    %c0_i32_1 = arith.constant 0 : i32
    return %c0_i32, %c0_i32_0 : i32, i32
  }
  func.func @transform_4(%arg0: i32) -> (i32, i32) {
    %c0_i32 = arith.constant 0 : i32
    %c0_i32_0 = arith.constant 0 : i32
    %c0_i32_1 = arith.constant 0 : i32
    return %c0_i32, %c0_i32_0 : i32, i32
  }
  func.func @transform_5(%arg0: i32) -> (i32, i32) {
    %c0_i32 = arith.constant 0 : i32
    %c0_i32_0 = arith.constant 0 : i32
    %c0_i32_1 = arith.constant 0 : i32
    return %c0_i32, %c0_i32_0 : i32, i32
  }
  func.func @transform_6(%arg0: i32) -> (i32, i32, i32) {
    %c0_i32 = arith.constant 0 : i32
    %c0_i32_0 = arith.constant 0 : i32
    %c0_i32_1 = arith.constant 0 : i32
    return %arg0, %c0_i32, %c0_i32_0 : i32, i32, i32
  }
}

</mosaic_0001>

<bundles_post_ra>
// kernel: tpu_custom_call.1
= control target key start
LH: loop header
LB: loop body
LE: loop exit
PB: predicated region body
PF: predicated region fallthrough
CT: control target
= control target key end

     0   :  { %11 = vsyncpa [#allocation3], 0  ;;  %s821_s0 = inlined_call_operand.vmem [shape: f32[2,4,256], index: 0, kind: input, shape index: {}]   ;;  %s822_s1 = inlined_call_operand.vmem [shape: f32[8,4], index: 1, kind: input, shape index: {}]   ;;  %s823_s2 = inlined_call_operand.vmem [shape: f32[8,1], index: 2, kind: input, shape index: {}]   ;;  %s824_s3 = inlined_call_operand.vmem [shape: f32[8,1], index: 3, kind: input, shape index: {}]   ;;  %s825_s4 = inlined_call_operand.vmem [shape: f32[4,8], index: 4, kind: input, shape index: {}]   ;;  %s826_s5 = inlined_call_operand.vmem [shape: f32[4,1], index: 5, kind: input, shape index: {}]   ;;  %s827_s6 = inlined_call_operand.hbm [shape: f32[2,4,256], index: 6, kind: output, shape index: {}]  }
   0x1   :  { %13 = vsyncpa [#allocation3 + $0x1], 0  ;;  %s706_s21 = smov 0   ;;  %s708_s22 = smov 0  }
   0x2   :  { %s710_s23 = smov 0   ;;  %s712_s24 = smov 0  }
   0x3 LB: > { %s727_s25 = sadd.s32 4294967295, %s666_s24   ;;  %s536_s26 = sadd.s32 4294967294, %s666_s24   ;;  %s666_s24 = sphi %s712_s24, %s833_s24   ;;  %s662_s23 = sphi %s710_s23, %s832_s23   ;;  %s658_s22 = sphi %s708_s22, %s831_s22   ;;  %s654_s21 = sphi %s706_s21, %s830_s21  }
   0x4   : > { %s731_s27 = sadd.s32 1, %s666_s24   ;;  %s157_s28 = sadd.s32 1, %s662_s23 }
   0x5   : > { %s154_s29 = ssub.s32 %s666_s24, %s731_s27  ;;  %p167_p0 = scmp.ne.s32.totalorder %s662_s23, %s658_s22 }
   0x6   : > { %p155_p1 = scmp.eq.s32.totalorder %s154_s29, 0  ;;  %p168_p2 = scmp.eq.s32.totalorder %s727_s25, 1 }
   0x7   : > { %p173_p3 = scmp.ne.s32.totalorder %s658_s22, %s654_s21  ;;  %p174_p4 = scmp.eq.s32.totalorder %s536_s26, 1 }
   0x8   : > { %s742_s30 = scalar_select %p155_p1, %s662_s23, %s157_s28  }
   0x9   : > { %p744_p5 = por %p168_p2, %p167_p0  ;;  %p748_p6 = por %p174_p4, %p173_p3 }
   0xa   : > { %p539_p7 = scmp.ge.s32.totalorder %s666_s24, 1  ;;  %p215_p8 = scmp.lt.s32.totalorder %s666_s24, 3 }
   0xc   : > { %p216_p9 = pnand %p539_p7, %p215_p8 }
   0xd   : > { %p245_p10 = scmp.lt.s32.totalorder (!%p216_p9), %s727_s25, 1  ;;  %v668_v0 = vmov (!%p216_p9), 0.0   ;;  %vm258_vm0 = vcmask (!%p216_p9), 1043456   ;;  %v251_v3 = vld [vmem:[%s822_s1] sm:$0xff] (!%p216_p9)  ;;  %vm254_vm1 = vcmask (!%p216_p9), 31744   ;;  %v669_v14 = vmov (!%p216_p9), 0  }
   0xe   : > { %219 = sbr.rel (%p216_p9) target bundleno = 939 (0x3ab), region = 44  ;;  %327 = vmatprep.mubr.f32.mxu0 (!%p216_p9), %v668_v0  ;;  %450 = vmatprep.mubr.f32.mxu1 (!%p216_p9), %v668_v0  ;;  %v346_v18 = vld [vmem:[%s823_s2] sm:$0xff] (!%p216_p9)  ;;  %vm382_vm2 = vcmask (!%p216_p9), 64512   ;;  %s553_s11 = sshll.u32 (!%p216_p9), %s727_s25, 7 }
   0xf   : > { %595 = vset.pattern.permute.xlu1 (!%p216_p9), %v669_v14  ;;  %596 = vset.pattern.permute.xlu0 (!%p216_p9), %v669_v14  ;;  %v357_v21 = vld [vmem:[%s824_s3] sm:$0xff] (!%p216_p9)  ;;  %s779_s16 = scalar_lea.hbm (!%p216_p9), %s827_s6, %s553_s11 }
  0x10   : > { %v376_v22 = vld [vmem:[%s826_s5] sm:$0xf] (!%p216_p9) }
  0x11   : > { %v375_v39 = vld [vmem:[%s825_s4] sm:$0xf] (!%p216_p9) }
  0x15   : > { %s246_s9 = scalar_select %p245_p10, %s727_s25, 1 }
  0x16   : > { %s670_s25 = smov [#allocation2]  }
  0x17   : > { %s552_s10 = sshll.u32 %s246_s9, 3  ;;  %s242_s9 = sand.u32 1, %s658_s22  }
  0x18   : > { %s249_s13 = scalar_lea.vmem %s821_s0, %s552_s10  ;;  %s540_s10 = sshll.u32 %s242_s9, 3 }
  0x19   : > { %v250_v1 = vld [vmem:[%s249_s13] sm:$0xff]  ;;  %s244_s12 = scalar_lea.vmem [#allocation2], %s540_s10  ;;  %s463_s17 = scalar_lea.sflag [#allocation3], %s242_s9 }
  0x1a   : > { %v253_v2 = vcombine.high %v250_v1, %v250_v1  ;;  %s477_s13 = sshll.u32 %s244_s12, 4  ;;  %s608_s19 = sshll.u32 %s670_s25, 4  ;;  %s781_s13 = int_to_ptr.vmem [resolvable:$true] %s477_s13  ;;  %s609_s19 = int_to_ptr.vmem [resolvable:$false] %s608_s19 }
  0x1b   : > { %s604_s18 = scalar_lea.vmem %s781_s13, 128  ;;  %s610_s20 = scalar_lea.vmem %s609_s19, 256 }
  0x1c   : > { %543 = vmatprep.subr.msk.mxu0 %vm258_vm0, %v253_v2  ;;  %p605_p11 = scmp.ne.s32.totalorder %s781_s13, %s604_s18  ;;  %p611_p0 = scmp.lt.s32.totalorder %s781_s13, %s609_s19 }
  0x1d   : > { %544 = vmatpush1.msk.msra.mxu0 %vm258_vm0, %v250_v1  ;;  %p612_p1 = scmp.lt.s32.totalorder %s610_s20, %s604_s18 }
  0x1e   : > { %545 = vmatmul.mubr.msk.f32.vlgmr.msra.gmra.mrb[0].mxu0 %vm254_vm1, %v251_v3  ;;  %p606_p12 = pnand %p605_p11, %p744_p5 }
  0x1f   : > { %p613_p2 = por %p612_p1, %p611_p0 }
  0x20   : > { %p607_p13 = pneg %p606_p12 }
  0x22   : > { %p614_p3 = pnand %p613_p2, %p607_p13 }
  0xf1   : > { %v329_v4 = vpop.f32.mrb[0].mxu0 }
  0xf2   : > { %v331_v5 = vpop.f32.mrb[1].mxu0 }
  0xf3   : > { %v334_v6 = vadd.f32 %v331_v5, %v329_v4 }
  0xf5   : > { %335 = vadd.xlane.f32.xlu0 %v334_v6 }
 0x182   : > { %v336_v7 = vpop.xlane.xlu0 %335 }
 0x183   : > { %v337_v8 = vmul.f32 0.00390625, %v336_v7 }
 0x185   : > { %v338_v9 = vsub.f32 %v329_v4, %v337_v8  ;;  %v339_v10 = vsub.f32 %v331_v5, %v337_v8 }
 0x187   : > { %v340_v11 = vmul.f32 %v338_v9, %v338_v9  ;;  %v341_v12 = vmul.f32 %v339_v10, %v339_v10 }
 0x189   : > { %v342_v13 = vadd.f32 %v341_v12, %v340_v11 }
 0x18b   : > { %343 = vadd.xlane.f32.xlu0 %v342_v13 }
 0x1a1   : > { %379 = vperm.xlu0 %596, %v376_v22  }
 0x218   : > { %v344_v15 = vpop.xlane.xlu0 %343 }
 0x219   : > { %v345_v16 = vmul.f32 0.00390625, %v344_v15 }
 0x21b   : > { %v347_v17 = vadd.f32 1e-05, %v345_v16 }
 0x21d   : > { %598 = vrsqrt.f32 %v347_v17 }
 0x220   : > { %v380_v40 = vpop.permute.xlu0 %379 }
 0x227   : > { %v599_v19 = vpop.eup %598 }
 0x228   : > { %v349_v20 = vmul.f32 %v599_v19, %v346_v18 }
 0x22a   : > { %352 = vperm.xlu1 %595, %v349_v20  }
 0x22e   : > { %360 = vperm.xlu1 %595, %v357_v21  }
 0x2a9   : > { %v353_v23 = vpop.permute.xlu1 %352 }
 0x2aa   : > { %v355_v24 = vmul.f32 %v353_v23, %v338_v9  ;;  %v356_v25 = vmul.f32 %v353_v23, %v339_v10 }
 0x2ad   : > { %v361_v26 = vpop.permute.xlu1 %360 }
 0x2ae   : > { %v363_v27 = vadd.f32 %v361_v26, %v355_v24  ;;  %v364_v28 = vadd.f32 %v361_v26, %v356_v25 }
 0x2b0   : > { %v367_v29 = vmul.f32 0.70710677, %v363_v27  ;;  %v368_v30 = vmul.f32 0.70710677, %v364_v28  ;;  %v365_v33 = vmul.f32 0.5, %v363_v27  ;;  %v366_v35 = vmul.f32 0.5, %v364_v28 }
 0x2b2   : > { %600 = verf.f32 %v367_v29 }
 0x2b3   : > { %602 = verf.f32 %v368_v30 }
 0x2bc   : > { %v601_v31 = vpop.eup %600 }
 0x2bd   : > { %v603_v32 = vpop.eup %602  ;;  %v371_v34 = vadd.f32 1.0, %v601_v31 }
 0x2be   : > { %v372_v36 = vadd.f32 1.0, %v603_v32 }
 0x2bf   : > { %v373_v37 = vmul.f32 %v371_v34, %v365_v33 }
 0x2c0   : > { %v374_v38 = vmul.f32 %v372_v36, %v366_v35 }
 0x2c2   : > { %386 = vmatprep.subr.mxu1 %v374_v38 }
 0x2c3   : > { %387 = vmatpush1.msra.mxu1 %v373_v37 }
 0x2c4   : > { %546 = vmatmul.mubr.msk.f32.vlgmr.msra.gmra.mrb[0].mxu1 %vm382_vm2, %v375_v39 }
 0x397   : > { %v452_v41 = vpop.f32.mrb[0].mxu1 }
 0x398   : > { %v453_v42 = vadd.f32 %v452_v41, %v380_v40  ;;  %v454_v43 = vpop.f32.mrb[1].mxu1 }
 0x399   : > { %v455_v44 = vadd.f32 %v454_v43, %v380_v40 }
 0x39b   : > { %v459_v45 = vcombine.low %v453_v42, %v455_v44 }
 0x39d   : > { %461 = vst [vmem:[%s244_s12] sm:$0xff] %v459_v45 }
 0x39e   : > { %617 = shalt.err (!%p614_p3)
}
 0x39f   : > { %s618_s26 = scalar_lea.hbm %s779_s16, 128  ;;  %s622_s9 = scalar_lea.hbm %s827_s6, 256 }
 0x3a0   : > { %p619_p4 = scmp.ne.s32.totalorder %s779_s16, %s618_s26  ;;  %p623_p9 = scmp.lt.u32.totalorder %s779_s16, %s827_s6 }
 0x3a1   : > { %p624_p10 = scmp.lt.u32.totalorder %s622_s9, %s618_s26  ;;  %p626_p12 = scmp.lt.u32.totalorder %s618_s26, %s779_s16 }
 0x3a2   : > { %p620_p7 = pnand %p619_p4, %p744_p5 }
 0x3a3   : > { %p625_p11 = por %p624_p10, %p623_p9 }
 0x3a4   : > { %p621_p8 = pneg %p620_p7 }
 0x3a5   : > { %p627_p13 = por %p626_p12, %p625_p11 }
 0x3a7   : > { %p628_p0 = pnand %p627_p13, %p621_p8 }
 0x3a9   : > { %631 = shalt.err (!%p628_p0)
}
 0x3aa   : > { %554 = dma.vmem_to_hbm [thread:$0]  (%p744_p5), %s781_s13, 128, %s779_s16, %s463_s17  }
 0x3ab PF: > { %p560_p1 = scmp.ge.s32.totalorder %s666_s24, 2  ;;  %s489_s12 = sand.u32 1, %s654_s21  }
 0x3ac   : > { %s490_s14 = scalar_lea.sflag [#allocation3], %s489_s12 }
 0x3ad   : > { %p557_p2 = pnand %p560_p1, %p748_p6 }
 0x3af   : > { %649 = dma.done.wait (!%p557_p2), %s490_s14, 128  }
 0x3b0   : > { %651 = vsyncadd (!%p557_p2), %s490_s14, 4294967168  ;;  %p16_p3 = scmp.ge.s32.totalorder %s731_s27, 4   ;;  %s830_s21 = smov %s658_s22 }
 0x3b1   : > { %s831_s22 = smov %s662_s23  ;;  %s832_s23 = smov %s742_s30 }
 0x3b2   : > { %s833_s24 = smov %s731_s27  ;;  %18 = sbr.rel (!%p16_p3) target bundleno = 3 (0x3), region = 79 }
 0x3b9   :  { %495 = vsyncpa [#allocation3], 1 }
 0x3ba   :  { %497 = vsyncpa [#allocation3 + $0x1], 1 }

</bundles_post_ra>
